<compile_context>
chip_gen: v6e
topology: v6e:2x2x1
jax: 0.10.0
libtpu: 0.0.40
codegen_flags: <defaults>
</compile_context>

<pallas_src>
import functools

import jax
import jax.numpy as jnp
from jax.experimental import pallas as pl
from jax.experimental.pallas import tpu as pltpu


def _round_up(x, m):
    return ((x + m - 1) // m) * m


# ----------------------------- Pallas kernel --------------------------------
def _pconv_bn_relu_kernel(p_ref, s_ref, w_ref, b_ref, out_ref, *, slide_winsize):
    # p_ref : (K, TR)     bf16  masked-input patches (rows on the lane axis)
    # s_ref : (1, TR)     f32   per-window mask sums
    # w_ref : (Cout, K)   bf16  conv weight with BN scale folded in
    # b_ref : (Cout, 1)   f32   folded BN bias
    # out_ref:(Cout, TR)  f32
    raw = jnp.dot(w_ref[...], p_ref[...],
                  preferred_element_type=jnp.float32)              # (Cout, TR) on MXU

    msum = s_ref[...]                                              # (1, TR)
    update_mask = jnp.clip(msum, 0.0, 1.0)
    mask_ratio = (slide_winsize
                  * pl.reciprocal(msum + 1e-8, approx=True)        # EUP, free slot
                  * update_mask)                                   # (1, TR)

    out = raw * mask_ratio + b_ref[...]        # partial-conv renorm + folded BN
    out_ref[...] = jnp.maximum(out, 0.0).astype(out_ref.dtype)     # ReLU, lane-dense store


# ------------------------------- glue (JAX) ---------------------------------
def encoder_block_forward(x, mask, weight, bn_params,
                          kernel=(3, 3), stride=(2, 2), bn_eps=1e-5,
                          row_tile=1024):
    """EncoderBlock.forward with lstm_steps = gru_steps = 0.

    x, mask   : (B, T, Cin, H, W)   (T = 1)
    weight    : (Cout, Cin, kH, kW) (PyTorch OIHW)
    bn_params : (4, Cout) = [gamma, beta, running_mean, running_var]
    returns (output, mask, recurrent_state=None)
      output, mask : (B, T, Cout, Hout, Wout)
    """
    B, T, Cin, H, W = x.shape
    Cout = weight.shape[0]
    kH, kW = kernel
    sH, sW = stride
    pH, pW = kH // 2, kW // 2
    K = kH * kW * Cin
    slide_winsize = float(K)

    # sequence_to_batch
    N = B * T
    xb = x.reshape(N, Cin, H, W)
    mb = mask.reshape(N, Cin, H, W)

    Hout = (H + 2 * pH - kH) // sH + 1
    Wout = (W + 2 * pW - kW) // sW + 1
    rows = N * Hout * Wout

    # im2col of (input * mask) built directly in (K, rows) column form so the big
    # row axis lands on the lane axis of the kernel's loads/stores.
    xm = jnp.transpose(xb * mb, (1, 0, 2, 3))                          # (Cin, N, H, W)
    xm = jnp.pad(xm, ((0, 0), (0, 0), (pH, pH), (pW, pW)))
    cols = []
    for kh in range(kH):
        for kw in range(kW):
            cols.append(xm[:, :, kh:kh + (Hout - 1) * sH + 1:sH,
                                  kw:kw + (Wout - 1) * sW + 1:sW])     # (Cin, N, Ho, Wo)
    patches = jnp.stack(cols, axis=0).reshape(K, rows)   # K order (kh, kw, c); rows (n, h, w)
    patches = patches.astype(jnp.bfloat16)

    # Per-window mask sum via a single-output-channel ones-conv (cheap wrapper op);
    # replaces the K-lane-wide im2col'd mask stream of the previous version.
    msum = jax.lax.conv_general_dilated(
        mb, jnp.ones((1, Cin, kH, kW), mb.dtype), (sH, sW),
        ((pH, pH), (pW, pW)), dimension_numbers=('NCHW', 'OIHW', 'NCHW'))  # (N,1,Ho,Wo)
    msum_row = msum.reshape(1, rows).astype(jnp.float32)

    # Fold eval-mode BatchNorm into the weight columns (per Cout) and a bias.
    gamma, beta, rmean, rvar = bn_params[0], bn_params[1], bn_params[2], bn_params[3]
    scale = gamma * jax.lax.rsqrt(rvar + bn_eps)                       # (Cout,)
    w_mat = jnp.transpose(weight, (0, 2, 3, 1)).reshape(Cout, K)       # matches patch K order
    w_mat = (w_mat * scale[:, None]).astype(jnp.bfloat16)
    bias = (beta - rmean * scale).reshape(Cout, 1).astype(jnp.float32)

    # Row tiling: large tiles, rows padded up to a multiple of the tile.
    tr = min(row_tile, _round_up(rows, 128))
    rows_padded = _round_up(rows, tr)
    if rows_padded != rows:
        patches = jnp.pad(patches, ((0, 0), (0, rows_padded - rows)))
        msum_row = jnp.pad(msum_row, ((0, 0), (0, rows_padded - rows)))
    grid = (rows_padded // tr,)

    kernel_fn = functools.partial(_pconv_bn_relu_kernel, slide_winsize=slide_winsize)

    out_cols = pl.pallas_call(
        kernel_fn,
        out_shape=jax.ShapeDtypeStruct((Cout, rows_padded), jnp.float32),
        grid_spec=pltpu.PrefetchScalarGridSpec(
            num_scalar_prefetch=0,
            grid=grid,
            in_specs=[
                pl.BlockSpec((K, tr), lambda r: (0, r)),      # patches column tile
                pl.BlockSpec((1, tr), lambda r: (0, r)),      # mask-sum column tile
                pl.BlockSpec((Cout, K), lambda r: (0, 0)),    # folded weight (resident)
                pl.BlockSpec((Cout, 1), lambda r: (0, 0)),    # folded bias (resident)
            ],
            out_specs=pl.BlockSpec((Cout, tr), lambda r: (0, r)),
        ),
        compiler_params=pltpu.CompilerParams(
            dimension_semantics=("parallel",)),
    )(patches, msum_row, w_mat, bias)

    # (Cout, rows) -> NCHW -> batch_to_sequence
    out = out_cols[:, :rows].reshape(Cout, N, Hout, Wout)
    out = jnp.transpose(out, (1, 0, 2, 3)).reshape(B, T, Cout, Hout, Wout)

    # update_mask broadcast done outside the kernel (scalar per output pixel).
    update_mask = jnp.clip(msum, 0.0, 1.0)                             # (N, 1, Ho, Wo)
    new_mask = jnp.broadcast_to(update_mask, (N, Cout, Hout, Wout)).reshape(
        B, T, Cout, Hout, Wout)
    return out, new_mask, None


# ----------------------------- pure-JAX reference ----------------------------
def _reference_forward(x, mask, weight, bn_params, kernel, stride, bn_eps=1e-5):
    B, T, Cin, H, W = x.shape
    Cout = weight.shape[0]
    kH, kW = kernel
    sH, sW = stride
    pH, pW = kH // 2, kW // 2
    slide_winsize = float(Cin * kH * kW)

    xb = x.reshape(B * T, Cin, H, W)
    mb = mask.reshape(B * T, Cin, H, W)

    raw = jax.lax.conv_general_dilated(
        xb * mb, weight, (sH, sW), ((pH, pH), (pW, pW)),
        dimension_numbers=('NCHW', 'OIHW', 'NCHW'))
    msum = jax.lax.conv_general_dilated(
        mb, jnp.ones((1, Cin, kH, kW), jnp.float32), (sH, sW),
        ((pH, pH), (pW, pW)), dimension_numbers=('NCHW', 'OIHW', 'NCHW'))
    update_mask = jnp.clip(msum, 0.0, 1.0)
    mask_ratio = (slide_winsize / (msum + 1e-8)) * update_mask
    out = raw * mask_ratio

    gamma, beta, rmean, rvar = [bn_params[i].reshape(1, Cout, 1, 1) for i in range(4)]
    out = (out - rmean) * jax.lax.rsqrt(rvar + bn_eps) * gamma + beta
    out = jnp.maximum(out, 0.0)

    Hout, Wout = out.shape[2], out.shape[3]
    out = out.reshape(B, T, Cout, Hout, Wout)
    new_mask = jnp.broadcast_to(update_mask, (B * T, Cout, Hout, Wout)).reshape(
        B, T, Cout, Hout, Wout)
    return out, new_mask


# ----------------------------------- main ------------------------------------
if __name__ == "__main__":
    B, T, Cin, H, W = 2, 1, 4, 16, 16          # T = 2*steps + 1 with steps = 0
    Cout = 8
    kernel, stride = (3, 3), (2, 2)

    key = jax.random.PRNGKey(0)
    k1, k2, k3, k4, k5, k6, k7 = jax.random.split(key, 7)

    x = jax.random.normal(k1, (B, T, Cin, H, W), jnp.float32)
    mask = (jax.random.uniform(k2, (B, T, Cin, H, W)) > 0.3).astype(jnp.float32)

    # PConv weight (Kaiming-ish scale), deterministic
    fan_in = Cin * kernel[0] * kernel[1]
    weight = jax.random.normal(k3, (Cout, Cin, *kernel), jnp.float32) / jnp.sqrt(fan_in)

    # BatchNorm2d (eval mode) synthetic parameters: [gamma, beta, running_mean, running_var]
    gamma = 0.5 + jax.random.uniform(k4, (Cout,), jnp.float32)
    beta = 0.1 * jax.random.normal(k5, (Cout,), jnp.float32)
    rmean = 0.1 * jax.random.normal(k6, (Cout,), jnp.float32)
    rvar = 0.5 + jax.random.uniform(k7, (Cout,), jnp.float32)
    bn_params = jnp.stack([gamma, beta, rmean, rvar], axis=0)  # (4, Cout)

    out, new_mask, rec_state = encoder_block_forward(
        x, mask, weight, bn_params, kernel=kernel, stride=stride)
    jax.block_until_ready((out, new_mask))

    # sanity-check against pure-JAX reference (bf16 matmul -> loosened tolerance)
    ref_out, ref_mask = _reference_forward(x, mask, weight, bn_params, kernel, stride)
    assert out.shape == (B, T, Cout, H // 2, W // 2)
    assert jnp.allclose(out, ref_out, rtol=3e-2, atol=3e-2)
    assert jnp.allclose(new_mask, ref_mask, rtol=1e-5, atol=1e-5)
    assert rec_state is None

    print("KERNEL_OK")
</pallas_src>

<mosaic_0001>
module attributes {stable_mosaic.version = 11 : i64} {
  func.func @_pconv_bn_relu_kernel(%arg0: i32, %arg1: memref<36x128xbf16, #tpu.memory_space<vmem>>, %arg2: memref<1x128xf32, #tpu.memory_space<vmem>>, %arg3: memref<8x36xbf16, #tpu.memory_space<vmem>>, %arg4: memref<8x1xf32, #tpu.memory_space<vmem>>, %arg5: memref<8x128xf32, #tpu.memory_space<vmem>>) attributes {dimension_semantics = [#tpu.dimension_semantics<parallel>], iteration_bounds = array<i64: 1>, scalar_prefetch = 0 : i64, scratch_operands = 0 : i64, tpu.core_type = #tpu.core_type<tc>, window_params = [{transform_indices = @transform_0, window_bounds = array<i64: 36, 128>}, {transform_indices = @transform_1, window_bounds = array<i64: 1, 128>}, {pipeline_mode = #tpu.pipeline_mode<synchronous>, transform_indices = @transform_2, window_bounds = array<i64: 8, 36>}, {pipeline_mode = #tpu.pipeline_mode<synchronous>, transform_indices = @transform_3, window_bounds = array<i64: 8, 1>}, {transform_indices = @transform_4, window_bounds = array<i64: 8, 128>}]} {
    %c0 = arith.constant 0 : index
    %c0_0 = arith.constant 0 : index
    %0 = vector.load %arg3[%c0, %c0_0] : memref<8x36xbf16, #tpu.memory_space<vmem>>, vector<8x36xbf16>
    %c0_1 = arith.constant 0 : index
    %c0_2 = arith.constant 0 : index
    %1 = vector.load %arg1[%c0_1, %c0_2] : memref<36x128xbf16, #tpu.memory_space<vmem>>, vector<36x128xbf16>
    %cst = arith.constant dense<0.000000e+00> : vector<8x128xf32>
    %2 = tpu.matmul %0, %1, %cst {dimension_numbers = #tpu.dot_dimension_numbers<[1], [0], [0], [1], [0, 0, 1, 1], [], []>} : vector<8x36xbf16>, vector<36x128xbf16>, vector<8x128xf32> -> vector<8x128xf32>
    %c0_3 = arith.constant 0 : index
    %c0_4 = arith.constant 0 : index
    %3 = vector.load %arg2[%c0_3, %c0_4] : memref<1x128xf32, #tpu.memory_space<vmem>>, vector<1x128xf32>
    %cst_5 = arith.constant 0.000000e+00 : f32
    %cst_6 = arith.constant 1.000000e+00 : f32
    %4 = vector.broadcast %cst_5 : f32 to vector<1x128xf32>
    %5 = arith.maximumf %4, %3 : vector<1x128xf32>
    %6 = vector.broadcast %cst_6 : f32 to vector<1x128xf32>
    %7 = arith.minimumf %6, %5 : vector<1x128xf32>
    %cst_7 = arith.constant 9.99999993E-9 : f32
    %8 = vector.broadcast %cst_7 : f32 to vector<1x128xf32>
    %9 = arith.addf %3, %8 : vector<1x128xf32>
    %10 = tpu.reciprocal %9 {approx = true} : vector<1x128xf32> -> vector<1x128xf32>
    %cst_8 = arith.constant 3.600000e+01 : f32
    %11 = vector.broadcast %cst_8 : f32 to vector<1x128xf32>
    %12 = arith.mulf %11, %10 : vector<1x128xf32>
    %13 = arith.mulf %12, %7 : vector<1x128xf32>
    %14 = vector.broadcast %13 : vector<1x128xf32> to vector<8x128xf32>
    %15 = arith.mulf %2, %14 : vector<8x128xf32>
    %c0_9 = arith.constant 0 : index
    %c0_10 = arith.constant 0 : index
    %16 = vector.load %arg4[%c0_9, %c0_10] : memref<8x1xf32, #tpu.memory_space<vmem>>, vector<8x1xf32>
    %17 = vector.broadcast %16 : vector<8x1xf32> to vector<8x128xf32>
    %18 = arith.addf %15, %17 : vector<8x128xf32>
    %cst_11 = arith.constant 0.000000e+00 : f32
    %19 = vector.broadcast %cst_11 : f32 to vector<8x128xf32>
    %20 = arith.maximumf %18, %19 : vector<8x128xf32>
    %c0_12 = arith.constant 0 : index
    %c0_13 = arith.constant 0 : index
    %21 = vector.load %arg5[%c0_12, %c0_13] : memref<8x128xf32, #tpu.memory_space<vmem>>, vector<8x128xf32>
    tpu.vector_store %arg5[%c0_12, %c0_13], %20 {strides = array<i32>} : memref<8x128xf32, #tpu.memory_space<vmem>>, vector<8x128xf32>,
    return
  }
  func.func @transform_0(%arg0: i32) -> (i32, i32) {
    %c0_i32 = arith.constant 0 : i32
    %c0_i32_0 = arith.constant 0 : i32
    return %c0_i32, %arg0 : i32, i32
  }
  func.func @transform_1(%arg0: i32) -> (i32, i32) {
    %c0_i32 = arith.constant 0 : i32
    %c0_i32_0 = arith.constant 0 : i32
    return %c0_i32, %arg0 : i32, i32
  }
  func.func @transform_2(%arg0: i32) -> (i32, i32) {
    %c0_i32 = arith.constant 0 : i32
    %c0_i32_0 = arith.constant 0 : i32
    %c0_i32_1 = arith.constant 0 : i32
    return %c0_i32, %c0_i32_0 : i32, i32
  }
  func.func @transform_3(%arg0: i32) -> (i32, i32) {
    %c0_i32 = arith.constant 0 : i32
    %c0_i32_0 = arith.constant 0 : i32
    %c0_i32_1 = arith.constant 0 : i32
    return %c0_i32, %c0_i32_0 : i32, i32
  }
  func.func @transform_4(%arg0: i32) -> (i32, i32) {
    %c0_i32 = arith.constant 0 : i32
    %c0_i32_0 = arith.constant 0 : i32
    return %c0_i32, %arg0 : i32, i32
  }
}

</mosaic_0001>

<bundles_post_ra>
// kernel: tpu_custom_call.1
= control target key start
LH: loop header
LB: loop body
LE: loop exit
PB: predicated region body
PF: predicated region fallthrough
CT: control target
= control target key end

     0   :  { %9 = vsyncpa [#allocation3], 0  ;;  %s262_s0 = inlined_call_operand.hbm [shape: bf16[36,128], index: 0, kind: input, shape index: {}]   ;;  %s263_s1 = inlined_call_operand.vmem [shape: f32[1,128], index: 1, kind: input, shape index: {}]   ;;  %s264_s2 = inlined_call_operand.vmem [shape: bf16[8,36], index: 2, kind: input, shape index: {}]   ;;  %s265_s3 = inlined_call_operand.vmem [shape: f32[8,1], index: 3, kind: input, shape index: {}]   ;;  %s266_s4 = inlined_call_operand.hbm [shape: f32[8,128], index: 4, kind: output, shape index: {}]  }
   0x1   :  { %10 = vsyncpa [#allocation4], 0  ;;  %s215_s15 = smov [#allocation2]  }
   0x2   :  { %s16_s16 = sshll.u32 %s215_s15, 4  ;;  %s17_s16 = int_to_ptr.vmem [resolvable:$true] %s16_s16 }
   0x3   :  { %s179_s17 = scalar_lea.vmem %s17_s16, 320  ;;  %p184_p1 = scmp.lt.s32.totalorder %s17_s16, %s17_s16 }
   0x4   :  { %p180_p0 = scmp.ne.s32.totalorder %s17_s16, %s179_s17  ;;  %p185_p2 = scmp.lt.s32.totalorder %s179_s17, %s179_s17 }
   0x6   :  { %p186_p3 = por %p185_p2, %p184_p1 }
   0x8   :  { %p187_p4 = pnand %p186_p3, %p180_p0 }
   0xa   :  { %190 = shalt.err (!%p187_p4)
}
   0xb   :  { %s216_s18 = smov 64   ;;  %s217_s19 = smov 4  }
   0xc   :  { %22 = dma.hbm_to_vmem [thread:$0]  %s262_s0, 320, %s17_s16, [#allocation3], %s216_s18, %s216_s18, %s217_s19  }
   0xd   :  { %211 = dma.done.wait [#allocation3], 320  }
   0xe   :  { %212 = vsyncadd [#allocation3], 4294966976  ;;  %v218_v0 = vmov 0.0   ;;  %vm219_vm0 = vmmov 0   ;;  %v220_v1 = vmov 0   ;;  %vm58_vm1 = vcmask 1041408  }
   0xf   :  { %148 = vmatprep.subr.bf16.mxu0 %v218_v0  ;;  %154 = vmatprep.mubr.msk.bf16.mxu0 %vm219_vm0, %v218_v0  ;;  %v166_v2 = vld [vmem:[#allocation2 + $0x10] ss:$0 sps:$4 sm:$0x33]   ;;  %v167_v4 = vld [vmem:[#allocation2 + $0x8] sm:$0xff]   ;;  %v116_v5 = vld [vmem:[%s265_s3] sm:$0xff]  ;;  %vm54_vm2 = vcmask 293888   ;;  %v110_v11 = vlaneseq }
  0x10   :  { %165 = vset.pattern.permute.xlu0 %v220_v1  ;;  %v60_v3 = vsel %vm58_vm1, %v166_v2, 0  ;;  %v168_v6 = vld [vmem:[#allocation2] sm:$0xff]  }
  0x11   :  { %149 = vmatpush3.bf16.msra.mxu0 %v60_v3  ;;  %119 = vperm.xlu0 %165, %v116_v5   ;;  %v33_v7 = vld [vmem:[%s264_s2] sm:$0xf]  ;;  %v111_v15 = vshrl.u32 %v110_v11, 7  ;;  %s221_s2 = smov [#allocation5]  }
  0x12   :  { %150 = vmatprep.subr.bf16.mxu0 %v218_v0  ;;  %v102_v8 = vld [vmem:[%s263_s1] sm:$0x1]  ;;  %s131_s3 = sshll.u32 %s221_s2, 4  ;;  %s132_s3 = int_to_ptr.vmem [resolvable:$true] %s131_s3 }
  0x13   :  { %v105_v9 = vadd.f32 1e-08, %v102_v8  ;;  %v103_v10 = vmax.f32 %v102_v8, 0.0  ;;  %v112_v17 = vsub.s32 0, %v111_v15  ;;  %s191_s1 = scalar_lea.vmem %s132_s3, 128  ;;  %p196_p6 = scmp.lt.s32.totalorder %s132_s3, %s132_s3 }
  0x14   :  { %p192_p5 = scmp.ne.s32.totalorder %s132_s3, %s191_s1  ;;  %p197_p7 = scmp.lt.s32.totalorder %s191_s1, %s191_s1 }
  0x15   :  { %151 = vmatpush3.bf16.msra.mxu0 %v167_v4  ;;  %169 = vrcp.f32 %v105_v9  ;;  %v104_v13 = vmin.f32 %v103_v10, 1.0 }
  0x16   :  { %152 = vmatprep.subr.bf16.mxu0 %v218_v0  ;;  %p198_p8 = por %p197_p7, %p196_p6 }
  0x18   :  { %p199_p9 = pnand %p198_p8, %p192_p5 }
  0x19   :  { %153 = vmatpush3.bf16.msra.mxu0 %v168_v6 }
  0x1c   :  { %155 = vmatmul.mubr.msk.bf16.vlgmr.msra.gmra.mxu0 %vm54_vm2, %v33_v7 }
  0x22   :  { %v170_v12 = vpop.eup %169 }
  0x23   :  { %v107_v14 = vmul.f32 36.0, %v170_v12 }
  0x25   :  { %v108_v16 = vmul.f32 %v107_v14, %v104_v13 }
  0x27   :  { %v113_v18 = vrot.slane %v108_v16, %v112_v17 }
  0x8c   :  { %v120_v20 = vpop.permute.xlu0 %119 }
  0xdc   :  { %v96_v19 = vpop.f32.mrf.mxu0 }
  0xdd   :  { %v115_v21 = vmul.f32 %v113_v18, %v96_v19 }
  0xde   :  { %v156_v22 = vpop.f32.mrf.mxu0 }
  0xdf   :  { %v122_v23 = vadd.f32 %v120_v20, %v115_v21 }
  0xe0   :  { %v99_v24 = vpop.f32.mrf.mxu0 }
  0xe1   :  { %v123_v25 = vmax.f32 %v122_v23, 0.0 }
  0xe2   :  { %v157_v26 = vpop.f32.mrf.mxu0 }
  0xe3   :  { %124 = vst [vmem:[#allocation5] sm:$0xff] %v123_v25 }
  0xe4   :  { %202 = shalt.err (!%p199_p9)
}
  0xe5   :  { %134 = dma.vmem_to_hbm [thread:$0]  %s132_s3, 128, %s266_s4, [#allocation4]  }
  0xe6   :  { %213 = dma.done.wait [#allocation4], 128  }
  0xe7   :  { %214 = vsyncadd [#allocation4], 4294967168 }
  0xe8   :  { %138 = vsyncpa [#allocation3], 1 }
  0xe9   :  { %139 = vsyncpa [#allocation4], 1 }

</bundles_post_ra>
